<compile_context>
chip_gen: v7x
topology: tpu7x:2x2x1
jax: 0.10.0
libtpu: 0.0.40
codegen_flags: <defaults>
</compile_context>

<pallas_src>
import jax
import jax.numpy as jnp
from jax.experimental import pallas as pl
from jax.experimental.pallas import tpu as pltpu


def _round_up(a, b):
    return ((a + b - 1) // b) * b


def _pick_tile_hw(hw, n, c_in, c_out, itemsize, max_tile_hw, vmem_budget_bytes):
    """Pick the HW-lane tile: as big as the VMEM budget allows, 128-aligned."""
    if hw <= 128:
        return hw  # full-dim block; no (8,128) alignment constraint applies.
    cin_p = _round_up(c_in, 8)
    cout_p = _round_up(c_out, 8)
    # Double-buffered input + output blocks, bytes per HW lane.
    bytes_per_lane = (cin_p + cout_p) * itemsize * 2
    vmem_lanes = max(128, (vmem_budget_bytes // bytes_per_lane) // 128 * 128)
    tile = min(max_tile_hw, vmem_lanes, (hw // 128) * 128)
    tile = max(128, (tile // 128) * 128)
    if n == 1:
        # Keep >= ~4 grid steps so v7x's two TensorCores both get work.
        tile = min(tile, max(128, (hw // (4 * 128)) * 128))
    return tile


def _outconv_kernel(x_ref, p_ref, o_ref):
    # x_ref: (1, C_in, T)   one (batch, HW-tile) slab, channels on sublanes
    # p_ref: (R, C_in + 3)  packed params:
    #          col 0 = BN scale, col 1 = BN shift, col 2 = conv bias,
    #          cols 3.. = 1x1 conv weight rows (C_out, C_in)
    # o_ref: (1, C_out, T)  lane-dense output slab
    c_in = x_ref.shape[1]
    c_out = o_ref.shape[1]

    p = p_ref[...]                                 # tiny, single-vreg-ish
    scale = p[:c_in, 0:1]                          # (C_in, 1)
    shift = p[:c_in, 1:2]                          # (C_in, 1)
    bias = p[:c_out, 2:3]                          # (C_out, 1)
    w = p[:c_out, 3:3 + c_in]                      # (C_out, C_in)

    x = x_ref[0]                                   # (C_in, T)
    h = jnp.maximum(x * scale + shift, 0.0)        # BN (eval) + ReLU on the VPU

    # 1x1 conv = (C_out, C_in) @ (C_in, T) on the MXU (extended slot), keeping
    # the VALU free for BN/ReLU; bias is one broadcast add per output chunk.
    y = jnp.dot(w, h, preferred_element_type=jnp.float32)
    o_ref[0] = (y + bias).astype(o_ref.dtype)


def outconv_forward(x_nchw, gamma, beta, running_mean, running_var,
                    conv_w, conv_b, *, eps=1e-5, max_tile_hw=32768,
                    vmem_block_budget_bytes=12 * 1024 * 1024):
    """Forward pass of outconv.  x_nchw: (N, C_in, H, W) -> (N, C_out, H, W)."""
    N, C_in, H, W = x_nchw.shape
    C_out = conv_w.shape[0]
    hw = H * W

    # Fold BN (eval) into per-channel scale/shift (O(C) glue work).
    scale = (gamma.astype(jnp.float32)
             / jnp.sqrt(running_var.astype(jnp.float32) + eps))        # (C_in,)
    shift = beta.astype(jnp.float32) - running_mean.astype(jnp.float32) * scale

    # Pack all tiny per-channel operands into ONE small VMEM operand.
    R = max(C_in, C_out)
    params = jnp.zeros((R, C_in + 3), jnp.float32)
    params = params.at[:C_in, 0].set(scale)
    params = params.at[:C_in, 1].set(shift)
    params = params.at[:C_out, 2].set(conv_b.astype(jnp.float32))
    params = params.at[:C_out, 3:].set(
        conv_w.reshape(C_out, C_in).astype(jnp.float32))

    tile_hw = _pick_tile_hw(hw, N, C_in, C_out, x_nchw.dtype.itemsize,
                            max_tile_hw, vmem_block_budget_bytes)
    grid = (N, pl.cdiv(hw, tile_hw))

    # NCHW-native view; metadata-only reshape (no extra HBM pass, no pad).
    x_rows = x_nchw.reshape(N, C_in, hw)

    out_rows = pl.pallas_call(
        _outconv_kernel,
        out_shape=jax.ShapeDtypeStruct((N, C_out, hw), x_nchw.dtype),
        grid_spec=pltpu.PrefetchScalarGridSpec(
            num_scalar_prefetch=0,
            grid=grid,
            in_specs=[
                pl.BlockSpec((1, C_in, tile_hw), lambda n, t: (n, 0, t)),   # x slab
                pl.BlockSpec((R, C_in + 3), lambda n, t: (0, 0)),           # params
            ],
            out_specs=pl.BlockSpec((1, C_out, tile_hw), lambda n, t: (n, 0, t)),
        ),
        compiler_params=pltpu.CompilerParams(
            dimension_semantics=("parallel", "parallel"),
            # Within the 32 MiB scoped budget on v7x (64 MiB physical) and a
            # raise over the 16 MiB default on v5e; block budget leaves slack.
            vmem_limit_bytes=32 * 1024 * 1024,
        ),
    )(x_rows, params)

    # No trailing slice: output was written exactly (ragged last tile clipped
    # by Pallas).  Metadata-only reshape back to NCHW.
    return out_rows.reshape(N, C_out, H, W)


def _reference(x_nchw, gamma, beta, running_mean, running_var,
               conv_w, conv_b, eps=1e-5):
    # Pure-JAX reference (eval-mode BN -> ReLU -> 1x1 conv), NCHW.
    scale = gamma / jnp.sqrt(running_var + eps)
    shift = beta - running_mean * scale
    h = x_nchw * scale[None, :, None, None] + shift[None, :, None, None]
    h = jnp.maximum(h, 0.0)
    y = jnp.einsum("nchw,oc->nohw", h, conv_w.reshape(conv_w.shape[0], -1))
    return y + conv_b[None, :, None, None]


if __name__ == "__main__":
    key = jax.random.PRNGKey(0)
    k1, k2, k3, k4, k5, k6, k7 = jax.random.split(key, 7)

    N, C_in, H, W = 2, 4, 16, 16
    C_out = 3

    x = jax.random.normal(k1, (N, C_in, H, W), dtype=jnp.float32)

    # Deterministic synthetic parameters (shapes per nn.BatchNorm2d / nn.Conv2d).
    gamma = jax.random.normal(k2, (C_in,), dtype=jnp.float32) * 0.1 + 1.0
    beta = jax.random.normal(k3, (C_in,), dtype=jnp.float32) * 0.1
    running_mean = jax.random.normal(k4, (C_in,), dtype=jnp.float32) * 0.1
    running_var = jnp.abs(jax.random.normal(k5, (C_in,), dtype=jnp.float32)) * 0.1 + 1.0
    conv_w = jax.random.normal(k6, (C_out, C_in, 1, 1), dtype=jnp.float32) * 0.1
    conv_b = jax.random.normal(k7, (C_out,), dtype=jnp.float32) * 0.1

    # MXU matmuls may use bf16 passes under default precision, so compare at
    # ~1e-2 tolerance (values are O(1); observed error is ~1e-3 or better).
    ATOL = RTOL = 1e-2

    out = outconv_forward(x, gamma, beta, running_mean, running_var, conv_w, conv_b)
    out = jax.block_until_ready(out)
    ref = _reference(x, gamma, beta, running_mean, running_var, conv_w, conv_b)
    assert out.shape == (N, C_out, H, W)
    assert jnp.allclose(out, ref, atol=ATOL, rtol=RTOL), "mismatch vs reference"

    # Ragged H*W (400, not a multiple of 128) with N=1: exercises the cdiv grid
    # with a partial boundary tile (no wrapper pad/slice) and the v7x grid cap.
    x2 = jax.random.normal(k1, (1, C_in, 20, 20), dtype=jnp.float32)
    out2 = jax.block_until_ready(
        outconv_forward(x2, gamma, beta, running_mean, running_var, conv_w, conv_b))
    ref2 = _reference(x2, gamma, beta, running_mean, running_var, conv_w, conv_b)
    assert out2.shape == (1, C_out, 20, 20)
    assert jnp.allclose(out2, ref2, atol=ATOL, rtol=RTOL), "mismatch vs reference (ragged)"

    print("KERNEL_OK")
</pallas_src>

<mosaic_0001>
module attributes {stable_mosaic.version = 11 : i64} {
  func.func @_outconv_kernel(%arg0: i32, %arg1: i32, %arg2: memref<1x4x256xf32, #tpu.memory_space<vmem>>, %arg3: memref<4x7xf32, #tpu.memory_space<vmem>>, %arg4: memref<1x3x256xf32, #tpu.memory_space<vmem>>) attributes {dimension_semantics = [#tpu.dimension_semantics<parallel>, #tpu.dimension_semantics<parallel>], iteration_bounds = array<i64: 2, 1>, scalar_prefetch = 0 : i64, scratch_operands = 0 : i64, tpu.core_type = #tpu.core_type<tc>, window_params = [{transform_indices = @transform_0, window_bounds = array<i64: 1, 4, 256>}, {pipeline_mode = #tpu.pipeline_mode<synchronous>, transform_indices = @transform_1, window_bounds = array<i64: 4, 7>}, {transform_indices = @transform_2, window_bounds = array<i64: 1, 3, 256>}]} {
    %c0 = arith.constant 0 : index
    %c0_0 = arith.constant 0 : index
    %0 = vector.load %arg3[%c0, %c0_0] : memref<4x7xf32, #tpu.memory_space<vmem>>, vector<4x7xf32>
    %1 = vector.extract_strided_slice %0 {offsets = [0, 0], sizes = [4, 1], strides = [1, 1]} : vector<4x7xf32> to vector<4x1xf32>
    %2 = vector.extract_strided_slice %0 {offsets = [0, 1], sizes = [4, 1], strides = [1, 1]} : vector<4x7xf32> to vector<4x1xf32>
    %3 = vector.extract_strided_slice %0 {offsets = [0, 2], sizes = [3, 1], strides = [1, 1]} : vector<4x7xf32> to vector<3x1xf32>
    %4 = vector.extract_strided_slice %0 {offsets = [0, 3], sizes = [3, 4], strides = [1, 1]} : vector<4x7xf32> to vector<3x4xf32>
    %c0_1 = arith.constant 0 : index
    %c0_2 = arith.constant 0 : index
    %c0_3 = arith.constant 0 : index
    %5 = vector.load %arg2[%c0_1, %c0_2, %c0_3] : memref<1x4x256xf32, #tpu.memory_space<vmem>>, vector<1x4x256xf32>
    %6 = vector.shape_cast %5 : vector<1x4x256xf32> to vector<4x256xf32>
    %7 = vector.broadcast %1 : vector<4x1xf32> to vector<4x256xf32>
    %8 = arith.mulf %6, %7 : vector<4x256xf32>
    %9 = vector.broadcast %2 : vector<4x1xf32> to vector<4x256xf32>
    %10 = arith.addf %8, %9 : vector<4x256xf32>
    %cst = arith.constant 0.000000e+00 : f32
    %11 = vector.broadcast %cst : f32 to vector<4x256xf32>
    %12 = arith.maximumf %10, %11 : vector<4x256xf32>
    %cst_4 = arith.constant dense<0.000000e+00> : vector<3x256xf32>
    %13 = tpu.matmul %4, %12, %cst_4 {dimension_numbers = #tpu.dot_dimension_numbers<[1], [0], [0], [1], [0, 0, 1, 1], [], []>} : vector<3x4xf32>, vector<4x256xf32>, vector<3x256xf32> -> vector<3x256xf32>
    %14 = vector.broadcast %3 : vector<3x1xf32> to vector<3x256xf32>
    %15 = arith.addf %13, %14 : vector<3x256xf32>
    %c0_5 = arith.constant 0 : index
    %c0_6 = arith.constant 0 : index
    %c0_7 = arith.constant 0 : index
    %16 = vector.load %arg4[%c0_5, %c0_6, %c0_7] : memref<1x3x256xf32, #tpu.memory_space<vmem>>, vector<1x3x256xf32>
    %17 = vector.shape_cast %16 : vector<1x3x256xf32> to vector<3x256xf32>
    %18 = vector.shape_cast %15 : vector<3x256xf32> to vector<1x3x256xf32>
    tpu.vector_store %arg4[%c0_5, %c0_6, %c0_7], %18 {strides = array<i32>} : memref<1x3x256xf32, #tpu.memory_space<vmem>>, vector<1x3x256xf32>,
    return
  }
  func.func @transform_0(%arg0: i32, %arg1: i32) -> (i32, i32, i32) {
    %c0_i32 = arith.constant 0 : i32
    %c0_i32_0 = arith.constant 0 : i32
    return %arg0, %c0_i32, %arg1 : i32, i32, i32
  }
  func.func @transform_1(%arg0: i32, %arg1: i32) -> (i32, i32) {
    %c0_i32 = arith.constant 0 : i32
    %c0_i32_0 = arith.constant 0 : i32
    %c0_i32_1 = arith.constant 0 : i32
    return %c0_i32, %c0_i32_0 : i32, i32
  }
  func.func @transform_2(%arg0: i32, %arg1: i32) -> (i32, i32, i32) {
    %c0_i32 = arith.constant 0 : i32
    %c0_i32_0 = arith.constant 0 : i32
    return %arg0, %c0_i32, %arg1 : i32, i32, i32
  }
}

</mosaic_0001>

<bundles_post_ra>
// kernel: tpu_custom_call.1
= control target key start
LH: loop header
LB: loop body
LE: loop exit
PB: predicated region body
PF: predicated region fallthrough
CT: control target
= control target key end

     0   :  { %7 = vsyncpa [#allocation3], 0  ;;  %s827_s0 = inlined_call_operand.hbm [shape: f32[2,4,256], index: 0, kind: input, shape index: {}]   ;;  %s828_s1 = inlined_call_operand.hbm [shape: f32[4,7], index: 1, kind: input, shape index: {}]   ;;  %s829_s2 = inlined_call_operand.vmem [shape: f32[2,3,256], index: 2, kind: output, shape index: {}]  }
   0x1   :  { %9 = vsyncpa [#allocation3 + $0x1], 0 }
   0x2   :  { %10 = vsyncpa [#allocation5], 0  ;;  %s661_s9 = smov 0   ;;  %s663_s10 = smov 0  }
   0x3   :  { %s665_s11 = smov 0   ;;  %s667_s12 = smov 0  }
   0x4   :  { %s669_s13 = smov 0   ;;  %s671_s14 = smov 0  }
   0x5 LB: > { %s428_s15 = sadd.s32 4294967295, %s636_s14   ;;  %p50_p0 = scmp.ne.s32.totalorder %s620_s10, %s616_s9  ;;  %s636_s14 = sphi %s671_s14, %s16_s14   ;;  %s632_s13 = sphi %s669_s13, %s848_s13   ;;  %s628_s12 = sphi %s667_s12, %s847_s12   ;;  %s624_s11 = sphi %s665_s11, %s846_s11   ;;  %s620_s10 = sphi %s663_s10, %s845_s10   ;;  %s616_s9 = sphi %s661_s9, %s844_s9  }
   0x6   : > { %p691_p1 = scmp.eq.s32.totalorder %s428_s15, 0  ;;  %p430_p2 = scmp.ge.s32.totalorder %s636_s14, 1 }
   0x7   : > { %p110_p3 = scmp.lt.s32.totalorder %s636_s14, 3  ;;  %s638_s19 = smov [#allocation4]  }
   0x8   : > { %s834_s16 = scalar_select %p691_p1, 1, 0 }
   0x9   : > { %p699_p4 = por %p691_p1, %p50_p0  ;;  %p703_p5 = pnand %p430_p2, %p110_p3 }
   0xa   : > { %s123_s20 = sshll.u32 %s638_s19, 4  ;;  %s28_s22 = sadd.s32 1, %s632_s13  ;;  %s124_s20 = int_to_ptr.vmem [resolvable:$true] %s123_s20 }
   0xb   : > { %s835_s17 = scalar_select %p699_p4, 1, 0 }
   0xc   : > { %s836_s18 = scalar_select %p703_p5, 1, 0 }
   0xd   : > { %p454_p6 = pneg %p703_p5  ;;  %s37_s23 = sadd.s32 1, %s624_s11 }
   0xe   : > { %p717_p8 = scmp.ge.s32.totalorder %s28_s22, 2  ;;  %s524_s27 = scalar_lea.hbm %s828_s1, 64 }
   0xf   : > { %p711_p7 = pnand %p454_p6, %p691_p1  ;;  %p525_p9 = scmp.ne.s32.totalorder %s828_s1, %s524_s27 }
  0x10   : > { %s838_s24 = scalar_select %p717_p8, 1, 0 }
  0x11   : > { %p526_p10 = pneg %p711_p7  ;;  %p531_p13 = scmp.lt.u32.totalorder %s524_s27, %s828_s1 }
  0x13   : > { %p527_p11 = pnand %p526_p10, %p525_p9 }
  0x15   : > { %p528_p12 = pneg %p527_p11 }
  0x17   : > { %p533_p0 = pnand %p531_p13, %p528_p12 }
  0x19   : > { %536 = shalt.err (!%p533_p0)
}
  0x1a   : > { %s537_s4 = scalar_lea.vmem %s124_s20, 64  ;;  %p545_p1 = scmp.lt.s32.totalorder %s124_s20, %s124_s20 }
  0x1b   : > { %p538_p2 = scmp.ne.s32.totalorder %s124_s20, %s537_s4  ;;  %p546_p4 = scmp.lt.s32.totalorder %s537_s4, %s537_s4 }
  0x1d   : > { %p540_p3 = pnand %p538_p2, %p526_p10  ;;  %p547_p5 = por %p546_p4, %p545_p1 }
  0x1f   : > { %p541_p6 = pneg %p540_p3 }
  0x21   : > { %p548_p8 = pnand %p547_p5, %p541_p6 }
  0x23   : > { %551 = shalt.err (!%p548_p8)
}
  0x24   : > { %457 = dma.hbm_to_vmem [thread:$0]  (!%p711_p7), %s828_s1, 64, %s124_s20, [#allocation5]  }
  0x25   : > { %p839_p9 = scmp.ne.s32.totalorder %s838_s24, 0  ;;  %p44_p1 = scmp.ne.s32.totalorder %s624_s11, %s620_s10 }
  0x26   : > { %p45_p4 = scmp.eq.s32.totalorder %s636_s14, 0  ;;  %p463_p5 = scmp.lt.s32.totalorder %s636_s14, 2 }
  0x27   : > { %s850_s22 = smov (%p839_p9, %s28_s22), 0  ;;  %s134_s8 = sand.u32 1, %s624_s11  }
  0x28   : > { %s32_s7 = ssub.s32 %s632_s13, %s850_s22  ;;  %p46_p10 = por %p45_p4, %p44_p1 }
  0x29   : > { %p35_p8 = scmp.eq.s32.totalorder %s32_s7, 0  ;;  %s446_s9 = sshll.u32 %s632_s13, 7 }
  0x2a   : > { %s433_s19 = sshll.u32 %s134_s8, 3  ;;  %s757_s20 = scalar_lea.hbm %s827_s0, %s446_s9 }
  0x2b   : > { %s752_s15 = scalar_select %p35_p8, %s624_s11, %s37_s23  }
  0x2c   : > { %s138_s24 = scalar_lea.vmem [#allocation2], %s433_s19  ;;  %p759_p7 = pnand %p463_p5, %p46_p10 }
  0x2d   : > { %s148_s26 = sshll.u32 %s138_s24, 4  ;;  %s135_s23 = scalar_lea.sflag [#allocation3], %s134_s8  ;;  %s763_s26 = int_to_ptr.vmem [resolvable:$true] %s148_s26 }
  0x2e   : > { %s552_s28 = scalar_lea.hbm %s757_s20, 128  ;;  %p554_p12 = pneg %p759_p7 }
  0x2f   : > { %p553_p11 = scmp.ne.s32.totalorder %s757_s20, %s552_s28  ;;  %s557_s3 = scalar_lea.hbm %s827_s0, 256 }
  0x30   : > { %p558_p2 = scmp.lt.u32.totalorder %s757_s20, %s827_s0  ;;  %p559_p3 = scmp.lt.u32.totalorder %s557_s3, %s552_s28 }
  0x31   : > { %p555_p13 = pnand %p554_p12, %p553_p11  ;;  %p561_p9 = scmp.lt.u32.totalorder %s552_s28, %s757_s20 }
  0x32   : > { %p560_p6 = por %p559_p3, %p558_p2 }
  0x33   : > { %p556_p0 = pneg %p555_p13 }
  0x34   : > { %p562_p1 = por %p561_p9, %p560_p6 }
  0x36   : > { %p563_p4 = pnand %p562_p1, %p556_p0 }
  0x38   : > { %566 = shalt.err (!%p563_p4)
}
  0x39   : > { %s567_s6 = scalar_lea.vmem %s763_s26, 128  ;;  %s639_s7 = smov [#allocation2]  }
  0x3a   : > { %p568_p5 = scmp.ne.s32.totalorder %s763_s26, %s567_s6  ;;  %s572_s8 = sshll.u32 %s639_s7, 4  ;;  %s573_s8 = int_to_ptr.vmem [resolvable:$false] %s572_s8 }
  0x3b   : > { %s574_s9 = scalar_lea.vmem %s573_s8, 256  ;;  %p575_p11 = scmp.lt.s32.totalorder %s763_s26, %s573_s8 }
  0x3c   : > { %p570_p8 = pnand %p568_p5, %p554_p12  ;;  %p576_p13 = scmp.lt.s32.totalorder %s574_s9, %s567_s6 }
  0x3e   : > { %p571_p10 = pneg %p570_p8  ;;  %p577_p2 = por %p576_p13, %p575_p11 }
  0x40   : > { %p578_p3 = pnand %p577_p2, %p571_p10 }
  0x42   : > { %581 = shalt.err (!%p578_p3)
}
  0x43   : > { %461 = dma.hbm_to_vmem [thread:$0]  (!%p759_p7), %s757_s20, 128, %s763_s26, %s135_s23  }
  0x44   : > { %p841_p0 = scmp.ne.s32.totalorder %s836_s18, 0 }
  0x45   : > { %s159_s19 = sand.u32 (!%p841_p0), 1, %s620_s10   ;;  %p842_p12 = scmp.ne.s32.totalorder (!%p841_p0), %s835_s17, 0 }
  0x46   : > { %157 = sbr.rel (%p841_p0) target bundleno = 444 (0x1bc), region = 28  ;;  %s793_s21 = sshll.u32 (!%p841_p0), %s159_s19, 3 }
  0x47   : > { %s160_s25 = scalar_lea.sflag (!%p841_p0), [#allocation3], %s159_s19  ;;  %s163_s24 = scalar_lea.vmem (!%p841_p0), [#allocation2], %s793_s21 }
  0x4d   : > { %607 = dma.done.wait (%p842_p12), %s160_s25, 128  }
  0x4e   : > { %609 = vsyncadd (%p842_p12), %s160_s25, 4294967168  ;;  %p843_p6 = scmp.ne.s32.totalorder %s834_s16, 0 }
  0x50   : > { %611 = dma.done.wait (%p843_p6), [#allocation5], 64  }
  0x51   : > { %613 = vsyncadd (%p843_p6), [#allocation5], 4294967232  ;;  %v640_v0 = vmov 0   ;;  %v203_v1 = vld [vmem:[#allocation4] sm:$0xf]  ;;  %s641_s18 = smov 125   ;;  %v212_v7 = vlaneseq }
  0x52   : > { %520 = vset.pattern.permute.xlu0 %v640_v0  ;;  %235 = vrot.lane.b32.xlu1 %v203_v1, %s641_s18  ;;  %v642_v2 = vmov 1   ;;  %v643_v3 = vmov 0.0   ;;  %v644_v4 = vmov 2   ;;  %v645_v5 = vmov 839922192   ;;  %v204_v13 = vld [vmem:[%s163_s24] sm:$0xff] }
  0x53   : > { %207 = vperm.xlu0 %520, %v203_v1   ;;  %311 = vmatprep.mubr.f32.mxu0 %v643_v3  ;;  %v210_v6 = vunpack.c.l.s4 %v645_v5  ;;  %v213_v9 = vshrl.u32 %v212_v7, 7  ;;  %vm242_vm0 = vcmask 1043456   ;;  %vm239_vm1 = vcmask 31744   ;;  %p194_p7 = scmp.lt.s32.totalorder %s628_s12, 1 }
  0x54   : > { %522 = vset.pattern.permute.xlu1 %v644_v4 }
  0x55   : > { %v211_v8 = vunpack.c.0.s8 %v210_v6  ;;  %s852_s12 = smov (!%p194_p7, %s628_s12), 1 }
  0x56   : > { %232 = vperm.xlu1 %522, %v203_v1   ;;  %s447_s16 = sshll.u32 %s852_s12, 3 }
  0x57   : > { %521 = vset.pattern.permute.xlu0 %v642_v2  ;;  %v214_v10 = vsub.s32 %v211_v8, %v213_v9  ;;  %s201_s26 = scalar_lea.vmem %s829_s2, %s447_s16 }
  0x58   : > { %219 = vperm.xlu0 %521, %v203_v1  }
  0x5c   : > { %523 = vset.pattern.permute.xlu0 %v644_v4 }
  0xc4   : > { %v236_v20 = vpop.permute.xlu1 %235 }
  0xd2   : > { %v208_v11 = vpop.permute.xlu0 %207 }
  0xd3   : > { %v215_v12 = vrot.slane %v208_v11, %v214_v10 }
  0xd5   : > { %v217_v15 = vmul.f32 %v215_v12, %v204_v13  ;;  %v233_v21 = vpop.permute.xlu1 %232 }
  0xd7   : > { %v220_v14 = vpop.permute.xlu0 %219 }
  0xd8   : > { %v227_v16 = vrot.slane %v220_v14, %v214_v10 }
  0xda   : > { %v229_v17 = vadd.f32 %v227_v16, %v217_v15 }
  0xdc   : > { %v230_v18 = vmax.f32 %v229_v17, 0.0 }
  0xde   : > { %v238_v19 = vcombine.high %v230_v18, %v230_v18 }
  0xe0   : > { %441 = vmatprep.subr.msk.mxu0 %vm242_vm0, %v238_v19 }
  0xe1   : > { %442 = vmatpush1.msk.msra.mxu0 %vm242_vm0, %v230_v18 }
  0xe2   : > { %443 = vmatmul.mubr.msk.f32.vlgmr.msra.gmra.mrb[0].mxu0 %vm239_vm1, %v236_v20 }
 0x1b5   : > { %v313_v22 = vpop.f32.mrb[0].mxu0 }
 0x1b6   : > { %v314_v23 = vadd.f32 %v313_v22, %v233_v21  ;;  %v315_v24 = vpop.f32.mrb[1].mxu0 }
 0x1b7   : > { %v316_v25 = vadd.f32 %v315_v24, %v233_v21 }
 0x1b9   : > { %v320_v26 = vcombine.low %v314_v23, %v316_v25 }
 0x1bb   : > { %322 = vst [vmem:[%s201_s26] sm:$0x77] %v320_v26 }
 0x1bc PF: > { %s16_s14 = sadd.s32 1, %s636_s14   ;;  %s844_s9 = smov %s620_s10 }
 0x1bd   : > { %p13_p9 = scmp.ge.s32.totalorder %s16_s14, 4   ;;  %s845_s10 = smov %s624_s11 }
 0x1be   : > { %s846_s11 = smov %s752_s15  ;;  %s847_s12 = smov %s632_s13 }
 0x1bf   : > { %s848_s13 = smov %s850_s22  ;;  %15 = sbr.rel (!%p13_p9) target bundleno = 5 (0x5), region = 72 }
 0x1c6   :  { %353 = vsyncpa [#allocation3], 1 }
 0x1c7   :  { %355 = vsyncpa [#allocation3 + $0x1], 1 }
 0x1c8   :  { %356 = vsyncpa [#allocation5], 1 }

</bundles_post_ra>
